<compile_context>
chip_gen: v6e
topology: v6e:2x2x1
jax: 0.10.0
libtpu: 0.0.40
codegen_flags: <defaults>
</compile_context>

<pallas_src>
import numpy as np
import jax
import jax.numpy as jnp
from jax.experimental import pallas as pl
from jax.experimental.pallas import tpu as pltpu

NUM_CLASSES = 4                                   # nn.Embedding(4, 16) vocab size
EMB_DIM = 16                                      # nn.Embedding(4, 16) embedding dim
DATE_LANES = NUM_CLASSES * EMB_DIM                # 64 output floats per date
DATES_PER_ROW = 8                                 # 8 dates per logical output row
LANES_OUT = DATES_PER_ROW * DATE_LANES            # 512 lanes per output row
CHUNK_LANES = 128                                 # one vreg-width chunk = 2 dates
CHUNKS = LANES_OUT // CHUNK_LANES                 # 4 chunks per row
MAX_TILE_ROWS = 2048                              # 2048*512*4B = 4 MiB output tile
TARGET_GRID_STEPS = 8                             # keep >=2 steps for v7x dual-TC

_MONTH_TO_SEASON = {12: 1, 1: 1, 2: 1,
                    3: 2, 4: 2, 5: 2,
                    6: 3, 7: 3, 8: 3,
                    9: 0, 10: 0, 11: 0}


def _round_up(x, m):
    return (x + m - 1) // m * m


def season_from_dates(dates):
    # TODO(synk): "YYYY-MM-DD" string parsing is host-side Python control flow;
    # there is no Pallas equivalent. Precompute seasons outside the hot path.
    if isinstance(dates, str):
        dates = [dates]
    seasons = np.empty(len(dates), dtype=np.int32)
    for i, d in enumerate(dates):
        month = int(d[5:7])
        if month not in _MONTH_TO_SEASON:
            raise ValueError("Error in month: " + d)
        seasons[i] = _MONTH_TO_SEASON[month]
    return jnp.asarray(seasons)


def season_embed_kernel(seasons_ref, table_ref, out_ref):
    """Output row r packs dates (8r .. 8r+7); within a date's 64 lanes,
    lane -> class = (lane>>4)&3, emb dim = lane&15.
    value = table[1, dim] if class == season(date) else table[0, dim]."""
    # Lane constants, built once at (1, 128) and shared by all chunks.
    lane = jax.lax.broadcasted_iota(jnp.int32, (1, CHUNK_LANES), 1)
    first_date = lane < DATE_LANES                       # lanes 0..63 vs 64..127
    cls = jax.lax.shift_right_logical(lane, 4) & (NUM_CLASSES - 1)
    t0 = table_ref[0:1, :]                               # (1, 128) row 0, lane = dim%16
    t1 = table_ref[1:2, :]                               # (1, 128) row 1
    s = seasons_ref[...]                                 # (tile_rows, 8) int32

    for c in range(CHUNKS):                              # static loop: 4 x 128-lane chunks
        sa = s[:, 2 * c:2 * c + 1]                       # (tr, 1) season of even date
        sb = s[:, 2 * c + 1:2 * c + 2]                   # (tr, 1) season of odd date
        season = jnp.where(first_date, sa, sb)           # (tr, 128)
        out_ref[:, c * CHUNK_LANES:(c + 1) * CHUNK_LANES] = jnp.where(
            season == cls, t1, t0)


def season_embedding_pallas(seasons, table):
    """table[one_hot(seasons, 4)] -> (N, 4, 16) float32, computed in Pallas."""
    n = int(seasons.shape[0])
    if n == 0:
        return jnp.zeros((0, NUM_CLASSES, EMB_DIM), jnp.float32)

    rows = pl.cdiv(n, DATES_PER_ROW)                     # 512-lane output rows
    rows8 = _round_up(rows, 8)
    tile_rows = _round_up(pl.cdiv(rows8, TARGET_GRID_STEPS), 8)
    tile_rows = max(8, min(tile_rows, MAX_TILE_ROWS))
    n_steps = pl.cdiv(rows8, tile_rows)
    rows_pad = n_steps * tile_rows
    n_pad = rows_pad * DATES_PER_ROW

    seasons_pad = jnp.zeros((n_pad,), jnp.int32).at[:n].set(seasons.astype(jnp.int32))
    seasons2 = seasons_pad.reshape(rows_pad, DATES_PER_ROW)

    # Table rows 0/1 tiled across 128 lanes (lane -> emb dim = lane % 16).
    t01 = jnp.tile(table[:2].astype(jnp.float32), (1, CHUNK_LANES // EMB_DIM))  # (2, 128)

    out = pl.pallas_call(
        season_embed_kernel,
        out_shape=jax.ShapeDtypeStruct((rows_pad, LANES_OUT), jnp.float32),
        grid=(n_steps,),
        in_specs=[
            # seasons: last dim == full dim -> contiguous HBM segment per tile
            pl.BlockSpec((tile_rows, DATES_PER_ROW), lambda i: (i, 0)),
            # both table rows as one small resident block
            pl.BlockSpec((2, CHUNK_LANES), lambda i: (0, 0)),
        ],
        out_specs=pl.BlockSpec((tile_rows, LANES_OUT), lambda i: (i, 0)),
        compiler_params=pltpu.CompilerParams(dimension_semantics=("parallel",)),
    )(seasons2, t01)

    out = out.reshape(n_pad, NUM_CLASSES, EMB_DIM)
    if n_pad != n:
        # Only pay the slice copy when N is not a multiple of 64 dates; callers
        # that batch in multiples of 64 hit the copy-free path.
        out = out[:n]
    return out


class EmbeddingLayerSeasonPallas:
    # Below this batch size, pallas_call launch + padding overhead exceeds the
    # kernel time, so a plain XLA gather is faster.
    DEFAULT_PALLAS_MIN_DATES = 16384

    def __init__(self, embedding_dim, key, pallas_min_dates=None):
        self.embedding_dim = embedding_dim
        # nn.Embedding(4, 16).weight ~ N(0, 1), shape (4, 16), float32
        self.table = jax.random.normal(key, (NUM_CLASSES, EMB_DIM), dtype=jnp.float32)
        self.pallas_min_dates = (self.DEFAULT_PALLAS_MIN_DATES
                                 if pallas_min_dates is None else pallas_min_dates)

    def __call__(self, date):
        single = isinstance(date, str)
        seasons = season_from_dates(date)                    # (N,) int32
        n = int(seasons.shape[0])
        if n < self.pallas_min_dates:
            oh = jax.nn.one_hot(seasons, NUM_CLASSES, dtype=jnp.int32)
            out = self.table[oh]                             # (N, 4, 16)
        else:
            out = season_embedding_pallas(seasons, self.table)
        return out[0] if single else out


if __name__ == "__main__":
    key = jax.random.PRNGKey(0)
    k_w, k_m = jax.random.split(key)

    model = EmbeddingLayerSeasonPallas(EMB_DIM, k_w, pallas_min_dates=0)

    # Case 1: 50 dates (exercises row padding + trailing slice path).
    n_dates = 50
    months = jax.random.randint(k_m, (n_dates,), 1, 13)
    dates = ["2021-%02d-15" % int(m) for m in months]
    out = jax.block_until_ready(model(dates))

    seasons = season_from_dates(dates)
    ref = model.table[jax.nn.one_hot(seasons, NUM_CLASSES, dtype=jnp.int32)]
    assert out.shape == (n_dates, NUM_CLASSES, EMB_DIM)
    assert out.dtype == jnp.float32
    assert jnp.allclose(out, ref, atol=1e-6), "mismatch vs reference gather (padded case)"

    # Case 2: 128 dates (exact fit: multi-step grid, no padding, no post-kernel slice).
    n2 = 128
    months2 = jax.random.randint(jax.random.PRNGKey(1), (n2,), 1, 13)
    dates2 = ["2022-%02d-01" % int(m) for m in months2]
    out2 = jax.block_until_ready(model(dates2))
    seasons2 = season_from_dates(dates2)
    ref2 = model.table[jax.nn.one_hot(seasons2, NUM_CLASSES, dtype=jnp.int32)]
    assert out2.shape == (n2, NUM_CLASSES, EMB_DIM)
    assert jnp.allclose(out2, ref2, atol=1e-6), "mismatch vs reference gather (exact case)"

    print("KERNEL_OK")
</pallas_src>

<mosaic_0001>
module attributes {stable_mosaic.version = 11 : i64} {
  func.func @season_embed_kernel(%arg0: i32, %arg1: memref<8x8xi32, #tpu.memory_space<vmem>>, %arg2: memref<2x128xf32, #tpu.memory_space<vmem>>, %arg3: memref<8x512xf32, #tpu.memory_space<vmem>>) attributes {dimension_semantics = [#tpu.dimension_semantics<parallel>], iteration_bounds = array<i64: 1>, scalar_prefetch = 0 : i64, scratch_operands = 0 : i64, tpu.core_type = #tpu.core_type<tc>, window_params = [{transform_indices = @transform_0, window_bounds = array<i64: 8, 8>}, {pipeline_mode = #tpu.pipeline_mode<synchronous>, transform_indices = @transform_1, window_bounds = array<i64: 2, 128>}, {transform_indices = @transform_2, window_bounds = array<i64: 8, 512>}]} {
    %0 = tpu.iota {dimensions = array<i32: 1>} : vector<1x128xi32>
    %c64_i32 = arith.constant 64 : i32
    %1 = vector.broadcast %c64_i32 : i32 to vector<1x128xi32>
    %2 = arith.cmpi slt, %0, %1 : vector<1x128xi32>
    %c4_i32 = arith.constant 4 : i32
    %3 = vector.broadcast %c4_i32 : i32 to vector<1x128xi32>
    %4 = arith.shrui %0, %3 : vector<1x128xi32>
    %c3_i32 = arith.constant 3 : i32
    %5 = vector.broadcast %c3_i32 : i32 to vector<1x128xi32>
    %6 = arith.andi %4, %5 : vector<1x128xi32>
    %c0 = arith.constant 0 : index
    %c0_0 = arith.constant 0 : index
    %7 = vector.load %arg2[%c0, %c0_0] : memref<2x128xf32, #tpu.memory_space<vmem>>, vector<1x128xf32>
    %c1 = arith.constant 1 : index
    %c0_1 = arith.constant 0 : index
    %8 = vector.load %arg2[%c1, %c0_1] : memref<2x128xf32, #tpu.memory_space<vmem>>, vector<1x128xf32>
    %c0_2 = arith.constant 0 : index
    %c0_3 = arith.constant 0 : index
    %9 = vector.load %arg1[%c0_2, %c0_3] : memref<8x8xi32, #tpu.memory_space<vmem>>, vector<8x8xi32>
    %10 = vector.extract_strided_slice %9 {offsets = [0, 0], sizes = [8, 1], strides = [1, 1]} : vector<8x8xi32> to vector<8x1xi32>
    %11 = vector.extract_strided_slice %9 {offsets = [0, 1], sizes = [8, 1], strides = [1, 1]} : vector<8x8xi32> to vector<8x1xi32>
    %12 = vector.shape_cast %2 : vector<1x128xi1> to vector<1x128xi1>
    %13 = vector.broadcast %12 : vector<1x128xi1> to vector<8x128xi1>
    %14 = vector.shape_cast %10 : vector<8x1xi32> to vector<8x1xi32>
    %15 = vector.broadcast %14 : vector<8x1xi32> to vector<8x128xi32>
    %16 = vector.shape_cast %11 : vector<8x1xi32> to vector<8x1xi32>
    %17 = vector.broadcast %16 : vector<8x1xi32> to vector<8x128xi32>
    %18 = arith.select %13, %15, %17 : vector<8x128xi1>, vector<8x128xi32>
    %19 = vector.broadcast %6 : vector<1x128xi32> to vector<8x128xi32>
    %20 = arith.cmpi eq, %18, %19 : vector<8x128xi32>
    %21 = vector.shape_cast %8 : vector<1x128xf32> to vector<1x128xf32>
    %22 = vector.broadcast %21 : vector<1x128xf32> to vector<8x128xf32>
    %23 = vector.shape_cast %7 : vector<1x128xf32> to vector<1x128xf32>
    %24 = vector.broadcast %23 : vector<1x128xf32> to vector<8x128xf32>
    %25 = arith.select %20, %22, %24 : vector<8x128xi1>, vector<8x128xf32>
    %c0_4 = arith.constant 0 : index
    %c0_5 = arith.constant 0 : index
    %26 = vector.load %arg3[%c0_4, %c0_5] : memref<8x512xf32, #tpu.memory_space<vmem>>, vector<8x128xf32>
    tpu.vector_store %arg3[%c0_4, %c0_5], %25 {strides = array<i32>} : memref<8x512xf32, #tpu.memory_space<vmem>>, vector<8x128xf32>,
    %27 = vector.extract_strided_slice %9 {offsets = [0, 2], sizes = [8, 1], strides = [1, 1]} : vector<8x8xi32> to vector<8x1xi32>
    %28 = vector.extract_strided_slice %9 {offsets = [0, 3], sizes = [8, 1], strides = [1, 1]} : vector<8x8xi32> to vector<8x1xi32>
    %29 = vector.shape_cast %2 : vector<1x128xi1> to vector<1x128xi1>
    %30 = vector.broadcast %29 : vector<1x128xi1> to vector<8x128xi1>
    %31 = vector.shape_cast %27 : vector<8x1xi32> to vector<8x1xi32>
    %32 = vector.broadcast %31 : vector<8x1xi32> to vector<8x128xi32>
    %33 = vector.shape_cast %28 : vector<8x1xi32> to vector<8x1xi32>
    %34 = vector.broadcast %33 : vector<8x1xi32> to vector<8x128xi32>
    %35 = arith.select %30, %32, %34 : vector<8x128xi1>, vector<8x128xi32>
    %36 = vector.broadcast %6 : vector<1x128xi32> to vector<8x128xi32>
    %37 = arith.cmpi eq, %35, %36 : vector<8x128xi32>
    %38 = vector.shape_cast %8 : vector<1x128xf32> to vector<1x128xf32>
    %39 = vector.broadcast %38 : vector<1x128xf32> to vector<8x128xf32>
    %40 = vector.shape_cast %7 : vector<1x128xf32> to vector<1x128xf32>
    %41 = vector.broadcast %40 : vector<1x128xf32> to vector<8x128xf32>
    %42 = arith.select %37, %39, %41 : vector<8x128xi1>, vector<8x128xf32>
    %c0_6 = arith.constant 0 : index
    %c128 = arith.constant 128 : index
    %43 = vector.load %arg3[%c0_6, %c128] : memref<8x512xf32, #tpu.memory_space<vmem>>, vector<8x128xf32>
    tpu.vector_store %arg3[%c0_6, %c128], %42 {strides = array<i32>} : memref<8x512xf32, #tpu.memory_space<vmem>>, vector<8x128xf32>,
    %44 = vector.extract_strided_slice %9 {offsets = [0, 4], sizes = [8, 1], strides = [1, 1]} : vector<8x8xi32> to vector<8x1xi32>
    %45 = vector.extract_strided_slice %9 {offsets = [0, 5], sizes = [8, 1], strides = [1, 1]} : vector<8x8xi32> to vector<8x1xi32>
    %46 = vector.shape_cast %2 : vector<1x128xi1> to vector<1x128xi1>
    %47 = vector.broadcast %46 : vector<1x128xi1> to vector<8x128xi1>
    %48 = vector.shape_cast %44 : vector<8x1xi32> to vector<8x1xi32>
    %49 = vector.broadcast %48 : vector<8x1xi32> to vector<8x128xi32>
    %50 = vector.shape_cast %45 : vector<8x1xi32> to vector<8x1xi32>
    %51 = vector.broadcast %50 : vector<8x1xi32> to vector<8x128xi32>
    %52 = arith.select %47, %49, %51 : vector<8x128xi1>, vector<8x128xi32>
    %53 = vector.broadcast %6 : vector<1x128xi32> to vector<8x128xi32>
    %54 = arith.cmpi eq, %52, %53 : vector<8x128xi32>
    %55 = vector.shape_cast %8 : vector<1x128xf32> to vector<1x128xf32>
    %56 = vector.broadcast %55 : vector<1x128xf32> to vector<8x128xf32>
    %57 = vector.shape_cast %7 : vector<1x128xf32> to vector<1x128xf32>
    %58 = vector.broadcast %57 : vector<1x128xf32> to vector<8x128xf32>
    %59 = arith.select %54, %56, %58 : vector<8x128xi1>, vector<8x128xf32>
    %c0_7 = arith.constant 0 : index
    %c256 = arith.constant 256 : index
    %60 = vector.load %arg3[%c0_7, %c256] : memref<8x512xf32, #tpu.memory_space<vmem>>, vector<8x128xf32>
    tpu.vector_store %arg3[%c0_7, %c256], %59 {strides = array<i32>} : memref<8x512xf32, #tpu.memory_space<vmem>>, vector<8x128xf32>,
    %61 = vector.extract_strided_slice %9 {offsets = [0, 6], sizes = [8, 1], strides = [1, 1]} : vector<8x8xi32> to vector<8x1xi32>
    %62 = vector.extract_strided_slice %9 {offsets = [0, 7], sizes = [8, 1], strides = [1, 1]} : vector<8x8xi32> to vector<8x1xi32>
    %63 = vector.shape_cast %2 : vector<1x128xi1> to vector<1x128xi1>
    %64 = vector.broadcast %63 : vector<1x128xi1> to vector<8x128xi1>
    %65 = vector.shape_cast %61 : vector<8x1xi32> to vector<8x1xi32>
    %66 = vector.broadcast %65 : vector<8x1xi32> to vector<8x128xi32>
    %67 = vector.shape_cast %62 : vector<8x1xi32> to vector<8x1xi32>
    %68 = vector.broadcast %67 : vector<8x1xi32> to vector<8x128xi32>
    %69 = arith.select %64, %66, %68 : vector<8x128xi1>, vector<8x128xi32>
    %70 = vector.broadcast %6 : vector<1x128xi32> to vector<8x128xi32>
    %71 = arith.cmpi eq, %69, %70 : vector<8x128xi32>
    %72 = vector.shape_cast %8 : vector<1x128xf32> to vector<1x128xf32>
    %73 = vector.broadcast %72 : vector<1x128xf32> to vector<8x128xf32>
    %74 = vector.shape_cast %7 : vector<1x128xf32> to vector<1x128xf32>
    %75 = vector.broadcast %74 : vector<1x128xf32> to vector<8x128xf32>
    %76 = arith.select %71, %73, %75 : vector<8x128xi1>, vector<8x128xf32>
    %c0_8 = arith.constant 0 : index
    %c384 = arith.constant 384 : index
    %77 = vector.load %arg3[%c0_8, %c384] : memref<8x512xf32, #tpu.memory_space<vmem>>, vector<8x128xf32>
    tpu.vector_store %arg3[%c0_8, %c384], %76 {strides = array<i32>} : memref<8x512xf32, #tpu.memory_space<vmem>>, vector<8x128xf32>,
    return
  }
  func.func @transform_0(%arg0: i32) -> (i32, i32) {
    %c0_i32 = arith.constant 0 : i32
    %c0_i32_0 = arith.constant 0 : i32
    return %arg0, %c0_i32 : i32, i32
  }
  func.func @transform_1(%arg0: i32) -> (i32, i32) {
    %c0_i32 = arith.constant 0 : i32
    %c0_i32_0 = arith.constant 0 : i32
    %c0_i32_1 = arith.constant 0 : i32
    return %c0_i32, %c0_i32_0 : i32, i32
  }
  func.func @transform_2(%arg0: i32) -> (i32, i32) {
    %c0_i32 = arith.constant 0 : i32
    %c0_i32_0 = arith.constant 0 : i32
    return %arg0, %c0_i32 : i32, i32
  }
}

</mosaic_0001>

<bundles_post_ra>
// kernel: tpu_custom_call.1
= control target key start
LH: loop header
LB: loop body
LE: loop exit
PB: predicated region body
PF: predicated region fallthrough
CT: control target
= control target key end

     0   :  { %7 = vsyncpa [#allocation3], 0  ;;  %s237_s0 = inlined_call_operand.hbm [shape: s32[8,8], index: 0, kind: input, shape index: {}]   ;;  %s238_s1 = inlined_call_operand.hbm [shape: f32[2,128], index: 1, kind: input, shape index: {}]   ;;  %s239_s2 = inlined_call_operand.hbm [shape: f32[8,512], index: 2, kind: output, shape index: {}]  }
   0x1   :  { %8 = vsyncpa [#allocation6], 0 }
   0x2   :  { %9 = vsyncpa [#allocation4], 0  ;;  %s198_s9 = smov [#allocation2]   ;;  %s199_s11 = smov [#allocation5]  }
   0x3   :  { %s16_s10 = sshll.u32 %s198_s9, 4  ;;  %s26_s12 = sshll.u32 %s199_s11, 4  ;;  %s17_s10 = int_to_ptr.vmem [resolvable:$true] %s16_s10  ;;  %s27_s12 = int_to_ptr.vmem [resolvable:$true] %s26_s12 }
   0x4   :  { %s140_s13 = scalar_lea.vmem %s17_s10, 128  ;;  %p145_p1 = scmp.lt.s32.totalorder %s17_s10, %s17_s10 }
   0x5   :  { %p141_p0 = scmp.ne.s32.totalorder %s17_s10, %s140_s13  ;;  %p146_p2 = scmp.lt.s32.totalorder %s140_s13, %s140_s13 }
   0x7   :  { %p147_p3 = por %p146_p2, %p145_p1 }
   0x9   :  { %p148_p4 = pnand %p147_p3, %p141_p0 }
   0xb   :  { %151 = shalt.err (!%p148_p4)
}
   0xc   :  { %19 = dma.hbm_to_vmem [thread:$0]  %s237_s0, 128, %s17_s10, [#allocation3]  }
   0xd   :  { %s160_s16 = scalar_lea.vmem %s27_s12, 32  ;;  %p165_p6 = scmp.lt.s32.totalorder %s27_s12, %s27_s12 }
   0xe   :  { %p161_p5 = scmp.ne.s32.totalorder %s27_s12, %s160_s16  ;;  %p166_p7 = scmp.lt.s32.totalorder %s160_s16, %s160_s16 }
  0x10   :  { %p167_p8 = por %p166_p7, %p165_p6 }
  0x12   :  { %p168_p9 = pnand %p167_p8, %p161_p5 }
  0x14   :  { %171 = shalt.err (!%p168_p9)
}
  0x15   :  { %29 = dma.hbm_to_vmem [thread:$0]  %s238_s1, 32, %s27_s12, [#allocation6]  }
  0x16   :  { %192 = dma.done.wait [#allocation3], 128  }
  0x17   :  { %193 = vsyncadd [#allocation3], 4294967168 }
  0x18   :  { %194 = dma.done.wait [#allocation6], 32  }
  0x19   :  { %195 = vsyncadd [#allocation6], 4294967264  ;;  %v200_v0 = vmov 2   ;;  %v201_v1 = vmov 0   ;;  %v43_v2 = vld [vmem:[#allocation2] sm:$0xff]  ;;  %v202_v3 = vmov 3   ;;  %v36_v9 = vlaneseq }
  0x1a   :  { %125 = vset.pattern.permute.xlu1 %v200_v0  ;;  %123 = vset.pattern.permute.xlu0 %v201_v1  ;;  %v203_v4 = vmov 1   ;;  %v204_v5 = vmov 4   ;;  %v205_v6 = vmov 5   ;;  %v206_v7 = vmov 6   ;;  %v111_v16 = vld [vmem:[#allocation5] ss:$0 sm:$0xff] }
  0x1b   :  { %65 = vperm.xlu1 %125, %v43_v2   ;;  %47 = vperm.xlu0 %123, %v43_v2   ;;  %v207_v8 = vmov 7   ;;  %v37_v10 = vand.u32 127, %v36_v9  ;;  %v110_v17 = vld [vmem:[#allocation5 + $0x1] ss:$0 sm:$0xff]  ;;  %s208_s0 = smov [#allocation7]  }
  0x1c   :  { %s100_s1 = sshll.u32 %s208_s0, 4  ;;  %s101_s1 = int_to_ptr.vmem [resolvable:$true] %s100_s1 }
  0x1d   :  { %v39_v11 = vshrl.u32 %v37_v10, 4  ;;  %vm38_vm0 = vcmp.lt.s32.totalorder %v37_v10, 64  ;;  %s172_s19 = scalar_lea.vmem %s101_s1, 512  ;;  %p177_p11 = scmp.lt.s32.totalorder %s101_s1, %s101_s1 }
  0x1e   :  { %p173_p10 = scmp.ne.s32.totalorder %s101_s1, %s172_s19  ;;  %p178_p12 = scmp.lt.s32.totalorder %s172_s19, %s172_s19 }
  0x1f   :  { %126 = vset.pattern.permute.xlu1 %v202_v3  ;;  %124 = vset.pattern.permute.xlu0 %v203_v4  ;;  %v40_v14 = vand.u32 3, %v39_v11 }
  0x20   :  { %68 = vperm.xlu1 %126, %v43_v2   ;;  %50 = vperm.xlu0 %124, %v43_v2   ;;  %p179_p13 = por %p178_p12, %p177_p11 }
  0x22   :  { %p180_p0 = pnand %p179_p13, %p173_p10 }
  0x24   :  { %127 = vset.pattern.permute.xlu1 %v204_v5  ;;  %128 = vset.pattern.permute.xlu0 %v205_v6 }
  0x25   :  { %75 = vperm.xlu1 %127, %v43_v2   ;;  %78 = vperm.xlu0 %128, %v43_v2  }
  0x29   :  { %129 = vset.pattern.permute.xlu1 %v206_v7  ;;  %131 = vset.pattern.permute.xlu0 %v207_v8 }
  0x2a   :  { %85 = vperm.xlu1 %129, %v43_v2  }
  0x2e   :  { %130 = vset.pattern.permute.xlu1 %v207_v8 }
  0x2f   :  { %88 = vperm.xlu1 %130, %v43_v2  }
  0x96   :  { %v66_v12 = vpop.permute.xlu1 %65  ;;  %v48_v13 = vpop.permute.xlu0 %47 }
  0x9b   :  { %v69_v15 = vpop.permute.xlu1 %68  ;;  %v51_v18 = vpop.permute.xlu0 %50 }
  0x9c   :  { %v70_v19 = vsel %vm38_vm0, %v66_v12, %v69_v15  ;;  %v52_v20 = vsel %vm38_vm0, %v48_v13, %v51_v18 }
  0x9d   :  { %vm71_vm1 = vcmp.eq.s32.totalorder %v70_v19, %v40_v14  ;;  %vm53_vm2 = vcmp.eq.s32.totalorder %v52_v20, %v40_v14 }
  0x9e   :  { %v72_v21 = vsel %vm71_vm1, %v110_v17, %v111_v16  ;;  %v62_v22 = vsel %vm53_vm2, %v110_v17, %v111_v16 }
  0x9f   :  { %73 = vst [vmem:[#allocation7 + $0x8] sm:$0xff] %v72_v21  ;;  %63 = vst [vmem:[#allocation7] sm:$0xff] %v62_v22 }
  0xa0   :  { %v76_v23 = vpop.permute.xlu1 %75  ;;  %v79_v24 = vpop.permute.xlu0 %78 }
  0xa1   :  { %v80_v25 = vsel %vm38_vm0, %v76_v23, %v79_v24 }
  0xa2   :  { %vm81_vm3 = vcmp.eq.s32.totalorder %v80_v25, %v40_v14 }
  0xa3   :  { %v82_v26 = vsel %vm81_vm3, %v110_v17, %v111_v16 }
  0xa4   :  { %83 = vst [vmem:[#allocation7 + $0x10] sm:$0xff] %v82_v26 }
  0xa5   :  { %v86_v27 = vpop.permute.xlu1 %85 }
  0xaa   :  { %v89_v28 = vpop.permute.xlu1 %88 }
  0xab   :  { %v90_v29 = vsel %vm38_vm0, %v86_v27, %v89_v28 }
  0xac   :  { %vm91_vm4 = vcmp.eq.s32.totalorder %v90_v29, %v40_v14 }
  0xad   :  { %v92_v30 = vsel %vm91_vm4, %v110_v17, %v111_v16 }
  0xae   :  { %93 = vst [vmem:[#allocation7 + $0x18] sm:$0xff] %v92_v30 }
  0xaf   :  { %183 = shalt.err (!%p180_p0)
}
  0xb0   :  { %103 = dma.vmem_to_hbm [thread:$0]  %s101_s1, 512, %s239_s2, [#allocation4]  }
  0xb1   :  { %196 = dma.done.wait [#allocation4], 512  }
  0xb2   :  { %197 = vsyncadd [#allocation4], 4294966784 }
  0xb3   :  { %107 = vsyncpa [#allocation3], 1 }
  0xb4   :  { %108 = vsyncpa [#allocation6], 1 }
  0xb5   :  { %109 = vsyncpa [#allocation4], 1 }

</bundles_post_ra>
